<compile_context>
chip_gen: v5e
topology: v5e:2x2
jax: 0.10.0
libtpu: 0.0.40
codegen_flags: <defaults>
</compile_context>

<pallas_src>
import functools

import jax
import jax.numpy as jnp
from jax import lax
from jax.experimental import pallas as pl
from jax.experimental.pallas import tpu as pltpu


def _round_up(x, m):
    return (x + m - 1) // m * m


def _pick_row_tile(h, target=64):
    """Row tile near `target` that minimizes tail padding of H."""
    if h <= target:
        return max(h, 1)
    best, best_pad = target, (-h) % target
    lo = max(target // 2, 1)
    for th in range(target, lo - 1, -1):
        pad = (-h) % th
        if pad < best_pad:
            best, best_pad = th, pad
            if pad == 0:
                break
    return best


def _vmem_limit_bytes():
    """Raise the scoped-VMEM limit with headroom vs the chip's physical VMEM."""
    cap = 64 * 1024 * 1024
    try:
        info = pltpu.get_tpu_info()
        cap = int(getattr(info, "vmem_capacity_bytes", cap))
    except Exception:
        pass
    return min((cap * 3) // 4, 96 * 1024 * 1024)


def _head_kernel(x_ref, w3_ref, bias_ref, w1_ref, b1_ref, o_ref, *, fuse_kw_taps):
    """One grid step: `TH` output rows of one image, full BiseNetHead interior.

    x_ref:    (1, Hpad+2, W+2, Cin) bf16  spatially padded image
    w3_ref:   (KH, KW*Cin, Cmp)     bf16  3x3 conv weights (HWIO, kw-major),
                                          BN scale folded in, Cmid padded to Cmp
    bias_ref: (1, Cmp)  f32               folded BN bias (beta - mean*scale)
    w1_ref:   (Cmp, Cp) bf16              1x1 conv weights (classes padded to Cp)
    b1_ref:   (1, Cp)   f32               1x1 conv bias (padded)
    o_ref:    (1, TH, W, Cp) bf16         interior rows of the head output
    """
    TH, W = o_ref.shape[1], o_ref.shape[2]
    KH, kw_cin, _ = w3_ref.shape
    cin = x_ref.shape[3]
    KW = kw_cin // cin

    t = pl.program_id(1)
    row0 = pl.multiple_of(t * TH, TH)

    if fuse_kw_taps:
        # Gather the KW taps straight from the ref (no intermediate xs copy) and
        # fuse them into the contraction: K = KW*Cin.  Needs lane-aligned Cin.
        cols = jnp.concatenate(
            [x_ref[0, pl.ds(row0, TH + KH - 1), kw:kw + W, :] for kw in range(KW)],
            axis=-1)                                       # (TH+2, W, KW*Cin) bf16
        acc = None
        for kh in range(KH):
            rows = cols[kh:kh + TH].reshape(TH * W, kw_cin)  # cheap leading-dim slice
            d = jnp.dot(rows, w3_ref[kh], preferred_element_type=jnp.float32)
            acc = d if acc is None else acc + d            # single summed value
    else:
        # Safe fallback for tiny / unaligned Cin: per-tap matmuls (K = Cin).
        xs = x_ref[0, pl.ds(row0, TH + KH - 1), :, :]       # (TH+2, Wp, Cin)
        acc = None
        for kh in range(KH):
            for kw in range(KW):
                patch = xs[kh:kh + TH, kw:kw + W, :].reshape(TH * W, cin)
                d = jnp.dot(patch, w3_ref[kh, kw * cin:(kw + 1) * cin, :],
                            preferred_element_type=jnp.float32)
                acc = d if acc is None else acc + d

    # Folded eval-mode BatchNorm (scale already in w3) + ReLU in f32.
    y = jnp.maximum(acc + bias_ref[...], 0.0)

    # Fused 1x1 conv (+ bias): bf16 operands, f32 accumulation, bf16 store.
    z = jnp.dot(y.astype(w1_ref.dtype), w1_ref[...],
                preferred_element_type=jnp.float32) + b1_ref[...]
    o_ref[...] = z.reshape(1, TH, W, o_ref.shape[3]).astype(o_ref.dtype)


@functools.partial(jax.jit, static_argnames=("eps", "row_tile"))
def bisenet_head(x_nchw, w3_oihw, gamma, beta, running_mean, running_var,
                 w1_oihw, b1, *, eps=1e-5, row_tile=None):
    """BiseNetHead.forward (eval-mode BN).  Returns (N, classes, H+2, W+2) f32."""
    N, Cin, H, W = x_nchw.shape
    Cmid, Cin_w, KH, KW = w3_oihw.shape
    classes = w1_oihw.shape[0]
    assert Cin_w == Cin and w1_oihw.shape[1] == Cmid
    assert KH == 3 and KW == 3, "BiseNetHead uses a 3x3 conv with padding=1"

    TH = _pick_row_tile(H) if row_tile is None else max(1, min(row_tile, H))
    Hpad = _round_up(H, TH)             # tail rows computed on zero input, sliced off

    # ---- layout glue (plain JAX, outside the kernel) ----
    x = jnp.transpose(x_nchw, (0, 2, 3, 1))                             # NHWC
    xp = jnp.pad(x, ((0, 0), (1, 1 + (Hpad - H)), (1, 1), (0, 0)))
    xp = xp.astype(jnp.bfloat16)                                        # (N, Hpad+2, W+2, Cin)

    # Fold BatchNorm (running stats) into the 3x3 weights + a per-channel bias.
    scale = gamma.astype(jnp.float32) / jnp.sqrt(running_var.astype(jnp.float32) + eps)
    bias = beta.astype(jnp.float32) - running_mean.astype(jnp.float32) * scale

    # Pad Cmid to a lane-dense multiple of 128 (zero channels are free).
    Cmp = _round_up(Cmid, 128)
    w3 = jnp.transpose(w3_oihw, (2, 3, 1, 0)).astype(jnp.float32) * scale  # HWIO * scale
    w3 = jnp.pad(w3, ((0, 0), (0, 0), (0, 0), (0, Cmp - Cmid)))
    w3 = w3.reshape(KH, KW * Cin, Cmp).astype(jnp.bfloat16)
    bias2d = jnp.pad(bias, (0, Cmp - Cmid)).reshape(1, Cmp)

    # 1x1 conv weights/bias; pad classes to a lane-dense multiple of 128.
    Cp = _round_up(classes, 128)
    w1 = jnp.transpose(w1_oihw.reshape(classes, Cmid), (1, 0))          # (Cmid, classes)
    w1 = jnp.pad(w1, ((0, Cmp - Cmid), (0, Cp - classes))).astype(jnp.bfloat16)
    b1f = b1.astype(jnp.float32)
    b1_2d = jnp.pad(b1f, (0, Cp - classes)).reshape(1, Cp)

    Hp, Wp = Hpad + 2, W + 2
    # kw-tap fusion (big-K im2col matmul) only when Cin is lane-aligned.
    fuse_kw_taps = (Cin % 128 == 0)

    interior = pl.pallas_call(
        functools.partial(_head_kernel, fuse_kw_taps=fuse_kw_taps),
        out_shape=jax.ShapeDtypeStruct((N, Hpad, W, Cp), jnp.bfloat16),
        grid_spec=pltpu.PrefetchScalarGridSpec(
            num_scalar_prefetch=0,
            grid=(N, Hpad // TH),
            in_specs=[
                # Whole padded image per n; re-DMA'd only when n changes.
                pl.BlockSpec((1, Hp, Wp, Cin), lambda n, t: (n, 0, 0, 0)),
                pl.BlockSpec((KH, KW * Cin, Cmp), lambda n, t: (0, 0, 0)),
                pl.BlockSpec((1, Cmp), lambda n, t: (0, 0)),
                pl.BlockSpec((Cmp, Cp), lambda n, t: (0, 0)),
                pl.BlockSpec((1, Cp), lambda n, t: (0, 0)),
            ],
            out_specs=pl.BlockSpec((1, TH, W, Cp), lambda n, t: (n, t, 0, 0)),
        ),
        compiler_params=pltpu.CompilerParams(
            dimension_semantics=("parallel", "parallel"),
            vmem_limit_bytes=_vmem_limit_bytes()),
    )(xp, w3, bias2d, w1, b1_2d)

    # conv1x1 has padding=1 -> output is (H+2, W+2); the 1-wide border only sees
    # zero-padded input, so it equals the conv1x1 bias.  Do the border / NCHW
    # epilogue at `classes` width (not Cp=128) to avoid full-width extra passes.
    interior = interior[:, :H, :, :classes].astype(jnp.float32)
    Ho, Wo = H + 2, W + 2
    border = jnp.broadcast_to(b1f.reshape(1, 1, 1, classes), (N, Ho, Wo, classes))
    full = lax.dynamic_update_slice(border, interior, (0, 1, 1, 0))
    return jnp.transpose(full, (0, 3, 1, 2))                 # (N, classes, H+2, W+2)


def _torch_like_reference(x, w3, gamma, beta, mean, var, w1, b1, eps=1e-5,
                          mimic_bf16=True):
    """Plain-JAX reference for BiseNetHead.forward (eval-mode BN)."""
    f32 = jnp.float32

    def rnd(a):
        return a.astype(jnp.bfloat16).astype(f32) if mimic_bf16 else a

    y = lax.conv_general_dilated(
        rnd(x), rnd(w3), window_strides=(1, 1), padding=[(1, 1), (1, 1)],
        dimension_numbers=("NCHW", "OIHW", "NCHW"))
    scale = gamma / jnp.sqrt(var + eps)
    y = y * scale[None, :, None, None] + (beta - mean * scale)[None, :, None, None]
    y = jnp.maximum(y, 0.0)
    z = lax.conv_general_dilated(
        rnd(y), rnd(w1), window_strides=(1, 1), padding=[(1, 1), (1, 1)],
        dimension_numbers=("NCHW", "OIHW", "NCHW"))
    return z + b1[None, :, None, None]


if __name__ == "__main__":
    # ---- small config (unaligned-channel fallback path + non-dividing TH) ----
    key = jax.random.PRNGKey(0)
    ks = jax.random.split(key, 8)
    N, Cin, H, W = 2, 4, 16, 16
    Cmid, classes = 32, 8

    x = jax.random.normal(ks[0], (N, Cin, H, W), jnp.float32)
    w3 = jax.random.normal(ks[1], (Cmid, Cin, 3, 3), jnp.float32) * 0.2
    gamma = 1.0 + 0.1 * jax.random.normal(ks[2], (Cmid,), jnp.float32)
    beta = 0.1 * jax.random.normal(ks[3], (Cmid,), jnp.float32)
    running_mean = 0.1 * jax.random.normal(ks[4], (Cmid,), jnp.float32)
    running_var = 1.0 + 0.5 * jnp.abs(jax.random.normal(ks[5], (Cmid,), jnp.float32))
    w1 = jax.random.normal(ks[6], (classes, Cmid, 1, 1), jnp.float32) * 0.2
    b1 = 0.1 * jax.random.normal(ks[7], (classes,), jnp.float32)

    out = bisenet_head(x, w3, gamma, beta, running_mean, running_var, w1, b1,
                       row_tile=6)  # 6 does not divide 16 -> exercises tail padding
    out = jax.block_until_ready(out)
    assert out.shape == (N, classes, H + 2, W + 2), out.shape
    ref = _torch_like_reference(x, w3, gamma, beta, running_mean, running_var,
                                w1, b1)
    err = float(jnp.max(jnp.abs(out - ref)))
    assert jnp.allclose(out, ref, atol=2e-2, rtol=2e-2), err

    # ---- lane-aligned config (fused big-K im2col MXU path, padded Cmid/classes) ----
    k2 = jax.random.split(jax.random.PRNGKey(1), 8)
    N2, Cin2, H2, W2 = 1, 128, 32, 32
    Cmid2, classes2 = 64, 19

    x2 = jax.random.normal(k2[0], (N2, Cin2, H2, W2), jnp.float32)
    w3_2 = jax.random.normal(k2[1], (Cmid2, Cin2, 3, 3), jnp.float32) * 0.05
    gamma2 = 1.0 + 0.1 * jax.random.normal(k2[2], (Cmid2,), jnp.float32)
    beta2 = 0.1 * jax.random.normal(k2[3], (Cmid2,), jnp.float32)
    mean2 = 0.1 * jax.random.normal(k2[4], (Cmid2,), jnp.float32)
    var2 = 1.0 + 0.5 * jnp.abs(jax.random.normal(k2[5], (Cmid2,), jnp.float32))
    w1_2 = jax.random.normal(k2[6], (classes2, Cmid2, 1, 1), jnp.float32) * 0.1
    b1_2 = 0.1 * jax.random.normal(k2[7], (classes2,), jnp.float32)

    out2 = bisenet_head(x2, w3_2, gamma2, beta2, mean2, var2, w1_2, b1_2,
                        row_tile=12)  # 12 does not divide 32 -> tail on fused path
    out2 = jax.block_until_ready(out2)
    assert out2.shape == (N2, classes2, H2 + 2, W2 + 2), out2.shape
    ref2 = _torch_like_reference(x2, w3_2, gamma2, beta2, mean2, var2, w1_2, b1_2)
    err2 = float(jnp.max(jnp.abs(out2 - ref2)))
    assert jnp.allclose(out2, ref2, atol=2e-2, rtol=2e-2), err2

    print("KERNEL_OK")
</pallas_src>

<mosaic_0001>
module attributes {stable_mosaic.version = 11 : i64} {
  func.func @_head_kernel(%arg0: i32, %arg1: i32, %arg2: memref<1x20x18x4xbf16, #tpu.memory_space<vmem>>, %arg3: memref<3x12x128xbf16, #tpu.memory_space<vmem>>, %arg4: memref<1x128xf32, #tpu.memory_space<vmem>>, %arg5: memref<128x128xbf16, #tpu.memory_space<vmem>>, %arg6: memref<1x128xf32, #tpu.memory_space<vmem>>, %arg7: memref<1x6x16x128xbf16, #tpu.memory_space<vmem>>) attributes {dimension_semantics = [#tpu.dimension_semantics<parallel>, #tpu.dimension_semantics<parallel>], iteration_bounds = array<i64: 2, 3>, scalar_prefetch = 0 : i64, scratch_operands = 0 : i64, tpu.core_type = #tpu.core_type<tc>, window_params = [{transform_indices = @transform_0, window_bounds = array<i64: 1, 20, 18, 4>}, {pipeline_mode = #tpu.pipeline_mode<synchronous>, transform_indices = @transform_1, window_bounds = array<i64: 3, 12, 128>}, {pipeline_mode = #tpu.pipeline_mode<synchronous>, transform_indices = @transform_2, window_bounds = array<i64: 1, 128>}, {pipeline_mode = #tpu.pipeline_mode<synchronous>, transform_indices = @transform_3, window_bounds = array<i64: 128, 128>}, {pipeline_mode = #tpu.pipeline_mode<synchronous>, transform_indices = @transform_4, window_bounds = array<i64: 1, 128>}, {transform_indices = @transform_5, window_bounds = array<i64: 1, 6, 16, 128>}]} {
    %c6_i32 = arith.constant 6 : i32
    %0 = arith.muli %arg1, %c6_i32 : i32
    %1 = tpu.assume_multiple %0, 6 : i32
    %c0 = arith.constant 0 : index
    %2 = arith.index_cast %1 : i32 to index
    %c0_0 = arith.constant 0 : index
    %c0_1 = arith.constant 0 : index
    %3 = vector.load %arg2[%c0, %2, %c0_0, %c0_1] : memref<1x20x18x4xbf16, #tpu.memory_space<vmem>>, vector<1x8x18x4xbf16>
    %4 = vector.shape_cast %3 : vector<1x8x18x4xbf16> to vector<8x18x4xbf16>
    %5 = vector.extract_strided_slice %4 {offsets = [0, 0, 0], sizes = [6, 16, 4], strides = [1, 1, 1]} : vector<8x18x4xbf16> to vector<6x16x4xbf16>
    %6 = vector.shape_cast %5 : vector<6x16x4xbf16> to vector<96x4xbf16>
    %c0_2 = arith.constant 0 : index
    %c0_3 = arith.constant 0 : index
    %c0_4 = arith.constant 0 : index
    %7 = vector.load %arg3[%c0_2, %c0_3, %c0_4] : memref<3x12x128xbf16, #tpu.memory_space<vmem>>, vector<1x4x128xbf16>
    %8 = vector.shape_cast %7 : vector<1x4x128xbf16> to vector<4x128xbf16>
    %cst = arith.constant dense<0.000000e+00> : vector<96x128xf32>
    %9 = tpu.matmul %6, %8, %cst {dimension_numbers = #tpu.dot_dimension_numbers<[1], [0], [0], [1], [0, 0, 1, 1], [], []>} : vector<96x4xbf16>, vector<4x128xbf16>, vector<96x128xf32> -> vector<96x128xf32>
    %10 = vector.extract_strided_slice %4 {offsets = [0, 1, 0], sizes = [6, 16, 4], strides = [1, 1, 1]} : vector<8x18x4xbf16> to vector<6x16x4xbf16>
    %11 = vector.shape_cast %10 : vector<6x16x4xbf16> to vector<96x4xbf16>
    %c0_5 = arith.constant 0 : index
    %c4 = arith.constant 4 : index
    %c0_6 = arith.constant 0 : index
    %12 = vector.load %arg3[%c0_5, %c4, %c0_6] : memref<3x12x128xbf16, #tpu.memory_space<vmem>>, vector<1x4x128xbf16>
    %13 = vector.shape_cast %12 : vector<1x4x128xbf16> to vector<4x128xbf16>
    %cst_7 = arith.constant dense<0.000000e+00> : vector<96x128xf32>
    %14 = tpu.matmul %11, %13, %cst_7 {dimension_numbers = #tpu.dot_dimension_numbers<[1], [0], [0], [1], [0, 0, 1, 1], [], []>} : vector<96x4xbf16>, vector<4x128xbf16>, vector<96x128xf32> -> vector<96x128xf32>
    %15 = arith.addf %9, %14 : vector<96x128xf32>
    %16 = vector.extract_strided_slice %4 {offsets = [0, 2, 0], sizes = [6, 16, 4], strides = [1, 1, 1]} : vector<8x18x4xbf16> to vector<6x16x4xbf16>
    %17 = vector.shape_cast %16 : vector<6x16x4xbf16> to vector<96x4xbf16>
    %c0_8 = arith.constant 0 : index
    %c8 = arith.constant 8 : index
    %c0_9 = arith.constant 0 : index
    %18 = vector.load %arg3[%c0_8, %c8, %c0_9] : memref<3x12x128xbf16, #tpu.memory_space<vmem>>, vector<1x4x128xbf16>
    %19 = vector.shape_cast %18 : vector<1x4x128xbf16> to vector<4x128xbf16>
    %cst_10 = arith.constant dense<0.000000e+00> : vector<96x128xf32>
    %20 = tpu.matmul %17, %19, %cst_10 {dimension_numbers = #tpu.dot_dimension_numbers<[1], [0], [0], [1], [0, 0, 1, 1], [], []>} : vector<96x4xbf16>, vector<4x128xbf16>, vector<96x128xf32> -> vector<96x128xf32>
    %21 = arith.addf %15, %20 : vector<96x128xf32>
    %22 = vector.extract_strided_slice %4 {offsets = [1, 0, 0], sizes = [6, 16, 4], strides = [1, 1, 1]} : vector<8x18x4xbf16> to vector<6x16x4xbf16>
    %23 = vector.shape_cast %22 : vector<6x16x4xbf16> to vector<96x4xbf16>
    %c1 = arith.constant 1 : index
    %c0_11 = arith.constant 0 : index
    %c0_12 = arith.constant 0 : index
    %24 = vector.load %arg3[%c1, %c0_11, %c0_12] : memref<3x12x128xbf16, #tpu.memory_space<vmem>>, vector<1x4x128xbf16>
    %25 = vector.shape_cast %24 : vector<1x4x128xbf16> to vector<4x128xbf16>
    %cst_13 = arith.constant dense<0.000000e+00> : vector<96x128xf32>
    %26 = tpu.matmul %23, %25, %cst_13 {dimension_numbers = #tpu.dot_dimension_numbers<[1], [0], [0], [1], [0, 0, 1, 1], [], []>} : vector<96x4xbf16>, vector<4x128xbf16>, vector<96x128xf32> -> vector<96x128xf32>
    %27 = arith.addf %21, %26 : vector<96x128xf32>
    %28 = vector.extract_strided_slice %4 {offsets = [1, 1, 0], sizes = [6, 16, 4], strides = [1, 1, 1]} : vector<8x18x4xbf16> to vector<6x16x4xbf16>
    %29 = vector.shape_cast %28 : vector<6x16x4xbf16> to vector<96x4xbf16>
    %c1_14 = arith.constant 1 : index
    %c4_15 = arith.constant 4 : index
    %c0_16 = arith.constant 0 : index
    %30 = vector.load %arg3[%c1_14, %c4_15, %c0_16] : memref<3x12x128xbf16, #tpu.memory_space<vmem>>, vector<1x4x128xbf16>
    %31 = vector.shape_cast %30 : vector<1x4x128xbf16> to vector<4x128xbf16>
    %cst_17 = arith.constant dense<0.000000e+00> : vector<96x128xf32>
    %32 = tpu.matmul %29, %31, %cst_17 {dimension_numbers = #tpu.dot_dimension_numbers<[1], [0], [0], [1], [0, 0, 1, 1], [], []>} : vector<96x4xbf16>, vector<4x128xbf16>, vector<96x128xf32> -> vector<96x128xf32>
    %33 = arith.addf %27, %32 : vector<96x128xf32>
    %34 = vector.extract_strided_slice %4 {offsets = [1, 2, 0], sizes = [6, 16, 4], strides = [1, 1, 1]} : vector<8x18x4xbf16> to vector<6x16x4xbf16>
    %35 = vector.shape_cast %34 : vector<6x16x4xbf16> to vector<96x4xbf16>
    %c1_18 = arith.constant 1 : index
    %c8_19 = arith.constant 8 : index
    %c0_20 = arith.constant 0 : index
    %36 = vector.load %arg3[%c1_18, %c8_19, %c0_20] : memref<3x12x128xbf16, #tpu.memory_space<vmem>>, vector<1x4x128xbf16>
    %37 = vector.shape_cast %36 : vector<1x4x128xbf16> to vector<4x128xbf16>
    %cst_21 = arith.constant dense<0.000000e+00> : vector<96x128xf32>
    %38 = tpu.matmul %35, %37, %cst_21 {dimension_numbers = #tpu.dot_dimension_numbers<[1], [0], [0], [1], [0, 0, 1, 1], [], []>} : vector<96x4xbf16>, vector<4x128xbf16>, vector<96x128xf32> -> vector<96x128xf32>
    %39 = arith.addf %33, %38 : vector<96x128xf32>
    %40 = vector.extract_strided_slice %4 {offsets = [2, 0, 0], sizes = [6, 16, 4], strides = [1, 1, 1]} : vector<8x18x4xbf16> to vector<6x16x4xbf16>
    %41 = vector.shape_cast %40 : vector<6x16x4xbf16> to vector<96x4xbf16>
    %c2 = arith.constant 2 : index
    %c0_22 = arith.constant 0 : index
    %c0_23 = arith.constant 0 : index
    %42 = vector.load %arg3[%c2, %c0_22, %c0_23] : memref<3x12x128xbf16, #tpu.memory_space<vmem>>, vector<1x4x128xbf16>
    %43 = vector.shape_cast %42 : vector<1x4x128xbf16> to vector<4x128xbf16>
    %cst_24 = arith.constant dense<0.000000e+00> : vector<96x128xf32>
    %44 = tpu.matmul %41, %43, %cst_24 {dimension_numbers = #tpu.dot_dimension_numbers<[1], [0], [0], [1], [0, 0, 1, 1], [], []>} : vector<96x4xbf16>, vector<4x128xbf16>, vector<96x128xf32> -> vector<96x128xf32>
    %45 = arith.addf %39, %44 : vector<96x128xf32>
    %46 = vector.extract_strided_slice %4 {offsets = [2, 1, 0], sizes = [6, 16, 4], strides = [1, 1, 1]} : vector<8x18x4xbf16> to vector<6x16x4xbf16>
    %47 = vector.shape_cast %46 : vector<6x16x4xbf16> to vector<96x4xbf16>
    %c2_25 = arith.constant 2 : index
    %c4_26 = arith.constant 4 : index
    %c0_27 = arith.constant 0 : index
    %48 = vector.load %arg3[%c2_25, %c4_26, %c0_27] : memref<3x12x128xbf16, #tpu.memory_space<vmem>>, vector<1x4x128xbf16>
    %49 = vector.shape_cast %48 : vector<1x4x128xbf16> to vector<4x128xbf16>
    %cst_28 = arith.constant dense<0.000000e+00> : vector<96x128xf32>
    %50 = tpu.matmul %47, %49, %cst_28 {dimension_numbers = #tpu.dot_dimension_numbers<[1], [0], [0], [1], [0, 0, 1, 1], [], []>} : vector<96x4xbf16>, vector<4x128xbf16>, vector<96x128xf32> -> vector<96x128xf32>
    %51 = arith.addf %45, %50 : vector<96x128xf32>
    %52 = vector.extract_strided_slice %4 {offsets = [2, 2, 0], sizes = [6, 16, 4], strides = [1, 1, 1]} : vector<8x18x4xbf16> to vector<6x16x4xbf16>
    %53 = vector.shape_cast %52 : vector<6x16x4xbf16> to vector<96x4xbf16>
    %c2_29 = arith.constant 2 : index
    %c8_30 = arith.constant 8 : index
    %c0_31 = arith.constant 0 : index
    %54 = vector.load %arg3[%c2_29, %c8_30, %c0_31] : memref<3x12x128xbf16, #tpu.memory_space<vmem>>, vector<1x4x128xbf16>
    %55 = vector.shape_cast %54 : vector<1x4x128xbf16> to vector<4x128xbf16>
    %cst_32 = arith.constant dense<0.000000e+00> : vector<96x128xf32>
    %56 = tpu.matmul %53, %55, %cst_32 {dimension_numbers = #tpu.dot_dimension_numbers<[1], [0], [0], [1], [0, 0, 1, 1], [], []>} : vector<96x4xbf16>, vector<4x128xbf16>, vector<96x128xf32> -> vector<96x128xf32>
    %57 = arith.addf %51, %56 : vector<96x128xf32>
    %c0_33 = arith.constant 0 : index
    %c0_34 = arith.constant 0 : index
    %58 = vector.load %arg4[%c0_33, %c0_34] : memref<1x128xf32, #tpu.memory_space<vmem>>, vector<1x128xf32>
    %59 = vector.broadcast %58 : vector<1x128xf32> to vector<96x128xf32>
    %60 = arith.addf %57, %59 : vector<96x128xf32>
    %cst_35 = arith.constant 0.000000e+00 : f32
    %61 = vector.broadcast %cst_35 : f32 to vector<96x128xf32>
    %62 = arith.maximumf %60, %61 : vector<96x128xf32>
    %63 = arith.truncf %62 : vector<96x128xf32> to vector<96x128xbf16>
    %c0_36 = arith.constant 0 : index
    %c0_37 = arith.constant 0 : index
    %64 = vector.load %arg5[%c0_36, %c0_37] : memref<128x128xbf16, #tpu.memory_space<vmem>>, vector<128x128xbf16>
    %cst_38 = arith.constant dense<0.000000e+00> : vector<96x128xf32>
    %65 = tpu.matmul %63, %64, %cst_38 {dimension_numbers = #tpu.dot_dimension_numbers<[1], [0], [0], [1], [0, 0, 1, 1], [], []>} : vector<96x128xbf16>, vector<128x128xbf16>, vector<96x128xf32> -> vector<96x128xf32>
    %c0_39 = arith.constant 0 : index
    %c0_40 = arith.constant 0 : index
    %66 = vector.load %arg6[%c0_39, %c0_40] : memref<1x128xf32, #tpu.memory_space<vmem>>, vector<1x128xf32>
    %67 = vector.broadcast %66 : vector<1x128xf32> to vector<96x128xf32>
    %68 = arith.addf %65, %67 : vector<96x128xf32>
    %69 = vector.shape_cast %68 : vector<96x128xf32> to vector<1x6x16x128xf32>
    %70 = arith.truncf %69 : vector<1x6x16x128xf32> to vector<1x6x16x128xbf16>
    %c0_41 = arith.constant 0 : index
    %c0_42 = arith.constant 0 : index
    %c0_43 = arith.constant 0 : index
    %c0_44 = arith.constant 0 : index
    %71 = vector.load %arg7[%c0_41, %c0_42, %c0_43, %c0_44] : memref<1x6x16x128xbf16, #tpu.memory_space<vmem>>, vector<1x6x16x128xbf16>
    tpu.vector_store %arg7[%c0_41, %c0_42, %c0_43, %c0_44], %70 {strides = array<i32>} : memref<1x6x16x128xbf16, #tpu.memory_space<vmem>>, vector<1x6x16x128xbf16>,
    return
  }
  func.func @transform_0(%arg0: i32, %arg1: i32) -> (i32, i32, i32, i32) {
    %c0_i32 = arith.constant 0 : i32
    %c0_i32_0 = arith.constant 0 : i32
    %c0_i32_1 = arith.constant 0 : i32
    %c0_i32_2 = arith.constant 0 : i32
    return %arg0, %c0_i32, %c0_i32_0, %c0_i32_1 : i32, i32, i32, i32
  }
  func.func @transform_1(%arg0: i32, %arg1: i32) -> (i32, i32, i32) {
    %c0_i32 = arith.constant 0 : i32
    %c0_i32_0 = arith.constant 0 : i32
    %c0_i32_1 = arith.constant 0 : i32
    %c0_i32_2 = arith.constant 0 : i32
    return %c0_i32, %c0_i32_0, %c0_i32_1 : i32, i32, i32
  }
  func.func @transform_2(%arg0: i32, %arg1: i32) -> (i32, i32) {
    %c0_i32 = arith.constant 0 : i32
    %c0_i32_0 = arith.constant 0 : i32
    %c0_i32_1 = arith.constant 0 : i32
    return %c0_i32, %c0_i32_0 : i32, i32
  }
  func.func @transform_3(%arg0: i32, %arg1: i32) -> (i32, i32) {
    %c0_i32 = arith.constant 0 : i32
    %c0_i32_0 = arith.constant 0 : i32
    %c0_i32_1 = arith.constant 0 : i32
    return %c0_i32, %c0_i32_0 : i32, i32
  }
  func.func @transform_4(%arg0: i32, %arg1: i32) -> (i32, i32) {
    %c0_i32 = arith.constant 0 : i32
    %c0_i32_0 = arith.constant 0 : i32
    %c0_i32_1 = arith.constant 0 : i32
    return %c0_i32, %c0_i32_0 : i32, i32
  }
  func.func @transform_5(%arg0: i32, %arg1: i32) -> (i32, i32, i32, i32) {
    %c0_i32 = arith.constant 0 : i32
    %c0_i32_0 = arith.constant 0 : i32
    %c0_i32_1 = arith.constant 0 : i32
    return %arg0, %arg1, %c0_i32, %c0_i32_0 : i32, i32, i32, i32
  }
}

</mosaic_0001>

<bundles_post_ra>
// kernel: bisenet_head.1
= control target key start
LH: loop header
LB: loop body
LE: loop exit
PB: predicated region body
PF: predicated region fallthrough
CT: control target
= control target key end

     0   :  { %s1757_s18 = smov 0   ;;  %s1759_s19 = smov 0   ;;  %s2303_s0 = inlined_call_operand.vmem [shape: bf16[2,20,18,4], index: 0, kind: input, shape index: {}]   ;;  %s2304_s1 = inlined_call_operand.vmem [shape: bf16[3,12,128], index: 1, kind: input, shape index: {}]   ;;  %s2305_s2 = inlined_call_operand.vmem [shape: f32[1,128], index: 2, kind: input, shape index: {}]   ;;  %s2306_s3 = inlined_call_operand.vmem [shape: bf16[128,128], index: 3, kind: input, shape index: {}]   ;;  %s2307_s4 = inlined_call_operand.vmem [shape: f32[1,128], index: 4, kind: input, shape index: {}]   ;;  %s2308_s5 = inlined_call_operand.vmem [shape: bf16[2,18,16,128], index: 5, kind: output, shape index: {}]  }
   0x1   :  { %s1761_s20 = smov 0   ;;  %s1763_s21 = smov 0  }
   0x2   :  { %s1765_s22 = smov 0  }
   0x3 LB: > { %s24_s23 = sadd.s32 1, %s1717_s20  ;;  %s27_s24 = sadd.s32 1, %s1721_s21  ;;  %s1725_s22 = sphi %s1765_s22, %s15_s22   ;;  %s1721_s21 = sphi %s1763_s21, %s2316_s21   ;;  %s1717_s20 = sphi %s1761_s20, %s2315_s20   ;;  %s1713_s19 = sphi %s1759_s19, %s2314_s19   ;;  %s1709_s18 = sphi %s1757_s18, %s2313_s18  }
   0x4   : > { %p25_p0 = scmp.ge.s32.totalorder %s24_s23, 3  ;;  %p1449_p1 = scmp.ge.s32.totalorder %s1725_s22, 1 }
   0x5   : > { %p201_p2 = scmp.lt.s32.totalorder %s1725_s22, 7 }
   0x6   : > { %s2318_s23 = smov (%p25_p0, %s24_s23), 0  ;;  %s2320_s24 = smov (!%p25_p0, %s27_s24), %s1721_s21 }
   0x7   : > { %p202_p3 = pnand %p1449_p1, %p201_p2  ;;  %p29_p4 = scmp.ge.s32.totalorder %s2320_s24, 2 }
   0x8   : > { %p234_p5 = scmp.lt.s32.totalorder (!%p202_p3), %s1713_s19, 1  ;;  %s1589_s27 = smul.u32 (!%p202_p3), 72, %s1709_s18 }
   0x9   : > { %s2322_s24 = smov (%p29_p4, %s2320_s24), 0  ;;  %205 = sbr.rel (%p202_p3) target bundleno = 550 (0x226), region = 40 }
   0xa   : > { %s239_s6 = smul.u32 (!%p202_p3), 6, %s1709_s18 }
   0xc   : > { %p242_p6 = scmp.lt.s32.totalorder (!%p202_p3), %s239_s6, 17 }
   0xe   : > { %v279_v0 = vld [vmem:[%s2304_s1] sm:$0x3]  ;;  %vm469_vm0 = vcmask 1041408   ;;  %v427_v2 = vld [vmem:[%s2304_s1] sm:$0xc]  ;;  %s2324_s19 = smov (!%p234_p5, %s1713_s19), 1 }
   0xf   : > { %v561_v1 = vsel %vm469_vm0, %v279_v0, 0  ;;  %v447_v3 = vunpack.c.l.b16 %v427_v2  ;;  %v653_v4 = vld [vmem:[%s2304_s1 + $0x4] sm:$0x3]  ;;  %v1503_v5 = vld [vmem:[%s2304_s1 + $0x8] sm:$0x3]  ;;  %s1643_s11 = smul.u32 240, %s2324_s19 }
  0x10   : > { %1642 = vmatpush.bf16.msra.mxu3 %v561_v1  ;;  %570 = vmatpush.bf16.msra.mxu1 %v561_v1  ;;  %v1514_v6 = vld [vmem:[%s2304_s1 + $0x8] sm:$0xc]  ;;  %v755_v8 = vsel %vm469_vm0, %v1503_v5, 0  ;;  %vm450_vm1 = vcmask 31744   ;;  %vm280_vm2 = vsmask.f32 3328 }
  0x11   : > { %v448_v7 = vpack.c.b16 %v447_v3, %v447_v3  ;;  %s238_s14 = scalar_lea.vmem %s2303_s0, %s1643_s11  ;;  %v837_v10 = vunpack.c.l.b16 %v1514_v6  ;;  %vm281_vm3 = vsmask.f32 7440  ;;  %v691_v11 = vsel %vm469_vm0, %v653_v4, 0  ;;  %s2326_s6 = smov (!%p242_p6, %s239_s6), 17 }
  0x12   : > { %s1813_s15 = scalar_lea.vmem %s238_s14, %s1589_s27  ;;  %vm1857_vm4 = vmor %vm280_vm2, %vm281_vm3  ;;  %vm608_vm5 = vcmask 1042432   ;;  %vm609_vm6 = vcmask 1046532   ;;  %s1644_s7 = smul.u32 36, %s2324_s19 }
  0x13   : > { %v449_v9 = vrot.slane %v448_v7, 2  ;;  %v1817_v12 = vld [vmem:[%s1813_s15 + $0x24] sm:$0xff]  ;;  %v1827_v16 = vld [vmem:[%s1813_s15 + $0x2c] sm:$0x1]  ;;  %v1837_v22 = vld [vmem:[%s1813_s15] sm:$0xf]  ;;  %v838_v25 = vpack.c.b16 %v837_v10, %v837_v10 }
  0x14   : > { %764 = vmatpush.bf16.msrb.mxu3 %v755_v8  ;;  %v1821_v14 = vld [vmem:[%s1813_s15 + $0x24] sm:$0xf]  ;;  %v1824_v15 = vld [vmem:[%s1813_s15 + $0x28] sm:$0xf]  ;;  %v375_v21 = vshll.u32 %v1827_v16, 16  ;;  %v284_v32 = vshrl.u32 %v1837_v22, 16  ;;  %vm1990_vm7 = vmor %vm608_vm5, %vm609_vm6 }
  0x15   : > { %v471_v13 = vsel %vm469_vm0, %v449_v9, 0  ;;  %v356_v17 = vshrl.u32 %v1821_v14, 16  ;;  %v359_v18 = vshll.u32 %v1821_v14, 16  ;;  %v365_v19 = vshll.u32 %v1824_v15, 16  ;;  %1488 = vmatmul.msk.bf16.vlgmr.msra.gmra.mxu3 %vm450_vm1, %v1817_v12  ;;  %v1840_v23 = vld [vmem:[%s1813_s15 + $0x4] sm:$0xf] }
  0x16   : > { %1641 = vmatpush.bf16.msra.mxu2 %v471_v13  ;;  %480 = vmatpush.bf16.msra.mxu0 %v471_v13  ;;  %v369_v20 = vshrl.u32 %v1824_v15, 16  ;;  %v1590_v24 = vld [vmem:[%s1813_s15] sm:$0xff]  ;;  %v1844_v30 = vld [vmem:[%s1813_s15 + $0x8] sm:$0x1]  ;;  %v377_v31 = vrot.slane %v375_v21, 5  ;;  %v287_v33 = vshll.u32 %v1837_v22, 16 }
  0x17   : > { %v358_v26 = vrot.slane %v356_v17, 4  ;;  %v361_v27 = vrot.slane %v359_v18, 5  ;;  %v367_v28 = vrot.slane %v365_v19, 5  ;;  %v293_v34 = vshll.u32 %v1840_v23, 16  ;;  %1485 = vmatmul.msk.bf16.vlgmr.msra.gmra.mxu1 %vm450_vm1, %v1590_v24  ;;  %v1853_v39 = vld [vmem:[%s1813_s15 + $0x30] sm:$0xf] }
  0x18   : > { %v371_v29 = vrot.slane %v369_v20, 4  ;;  %v297_v37 = vshrl.u32 %v1840_v23, 16  ;;  %v303_v38 = vshll.u32 %v1844_v30, 16  ;;  %v286_v41 = vrot.slane %v284_v32, 4  ;;  %v1862_v44 = vld [vmem:[%s1813_s15 + $0x34] sm:$0xf] }
  0x19   : > { %v362_v35 = vor.u32 %v361_v27, %v358_v26  ;;  %v289_v42 = vrot.slane %v287_v33, 5  ;;  %v295_v43 = vrot.slane %v293_v34, 5  ;;  %v839_v50 = vrot.slane %v838_v25, 2  ;;  %v1871_v56 = vld [vmem:[%s1813_s15 + $0x38] sm:$0x1]  ;;  %v1896_v18 = vld [vmem:[%s1813_s15 + $0x30] sm:$0xff] }
  0x1a   : > { %700 = vmatpush.bf16.msrb.mxu2 %v691_v11  ;;  %v372_v36 = vor.u32 %v371_v29, %v367_v28  ;;  %v299_v47 = vrot.slane %v297_v37, 4  ;;  %v305_v48 = vrot.slane %v303_v38, 5  ;;  %v380_v51 = vshrl.u32 %v1853_v39, 16  ;;  %v1876_v62 = vld [vmem:[%s1813_s15 + $0xc] sm:$0xf]  ;;  %s1451_s8 = sshll.u32 %s2326_s6, 1 }
  0x1b   : > { %v363_v45 = vrot.slane %v362_v35, 4  ;;  %v290_v49 = vor.u32 %v289_v42, %v286_v41  ;;  %v383_v52 = vshll.u32 %v1853_v39, 16  ;;  %v389_v57 = vshll.u32 %v1862_v44, 16  ;;  %v1885_v7 = vld [vmem:[%s1813_s15 + $0x10] sm:$0xf]  ;;  %s246_s9 = sadd.s32 %s1644_s7, %s1451_s8 }
  0x1c   : > { %v373_v46 = vrot.slane %v372_v36, 4  ;;  %v300_v55 = vor.u32 %v299_v47, %v295_v43  ;;  %v844_v61 = vsel %vm469_vm0, %v839_v50, 0  ;;  %v382_v0 = vrot.slane %v380_v51, 4  ;;  %v1890_v11 = vld [vmem:[%s1813_s15 + $0x14] sm:$0x1]  ;;  %s1452_s12 = sshll.u32 %s246_s9, 2 }
  0x1d   : > { %v368_v53 = vsel %vm1857_vm4, %v363_v45, %v367_v28  ;;  %v291_v60 = vrot.slane %v290_v49, 4  ;;  %853 = vmatpush.bf16.msrb.mxu0 %v844_v61  ;;  %v385_v1 = vrot.slane %v383_v52, 5  ;;  %v391_v2 = vrot.slane %v389_v57, 5  ;;  %v1902_v28 = vld [vmem:[%s1813_s15 + $0xc] sm:$0xff]  ;;  %v1906_v34 = vld [vmem:[%s1813_s15 + $0x3c] sm:$0xf]  ;;  %s2280_s16 = scalar_lea.vmem %s2308_s5, %s1452_s12 }
  0x1e   : > { %v378_v54 = vsel %vm1857_vm4, %v373_v46, %v377_v31  ;;  %v434_v58 = vunpack.c.l.b16 %v368_v53  ;;  %v301_v63 = vrot.slane %v300_v55, 4  ;;  %v393_v5 = vshrl.u32 %v1862_v44, 16  ;;  %v1909_v35 = vld [vmem:[%s1813_s15 + $0x40] sm:$0xf]  ;;  %v1924_v52 = vld [vmem:[%s1813_s15 + $0x44] sm:$0x1] }
  0x1f   : > { %v435_v59 = vunpack.c.l.b16 %v378_v54  ;;  %v296_v4 = vsel %vm1857_vm4, %v291_v60, %v295_v43  ;;  %v399_v6 = vshll.u32 %v1871_v56, 16  ;;  %v386_v10 = vor.u32 %v385_v1, %v382_v0  ;;  %v1933_v0 = vld [vmem:[%s1813_s15 + $0x1c] sm:$0xf] }
  0x20   : > { %v306_v8 = vsel %vm1857_vm4, %v301_v63, %v305_v48  ;;  %v428_v9 = vunpack.c.l.b16 %v296_v4  ;;  %v308_v13 = vshrl.u32 %v1876_v62, 16  ;;  %v395_v19 = vrot.slane %v393_v5, 4 }
  0x21   : > { %v1878_v3 = vpack.c.b16 %v435_v59, %v434_v58  ;;  %v429_v17 = vunpack.c.l.b16 %v306_v8  ;;  %v401_v20 = vrot.slane %v399_v6, 5  ;;  %v311_v21 = vshll.u32 %v1876_v62, 16  ;;  %v1928_v59 = vld [vmem:[%s1813_s15 + $0x18] sm:$0xf] }
  0x22   : > { %v387_v24 = vrot.slane %v386_v10, 4  ;;  %v310_v25 = vrot.slane %v308_v13, 4  ;;  %v317_v26 = vshll.u32 %v1885_v7, 16  ;;  %v321_v27 = vshrl.u32 %v1885_v7, 16 }
  0x23   : > { %1458 = vmatmul.msk.bf16.vlgmr.msra.gmra.mxu2 %vm450_vm1, %v1878_v3  ;;  %v440_v29 = vpack.c.b16 %v429_v17, %v428_v9  ;;  %v396_v31 = vor.u32 %v395_v19, %v391_v2  ;;  %v313_v32 = vrot.slane %v311_v21, 5  ;;  %v327_v33 = vshll.u32 %v1890_v11, 16 }
  0x24   : > { %v392_v36 = vsel %vm1857_vm4, %v387_v24, %v391_v2  ;;  %v319_v37 = vrot.slane %v317_v26, 5  ;;  %v323_v38 = vrot.slane %v321_v27, 4  ;;  %v404_v46 = vshrl.u32 %v1906_v34, 16 }
  0x25   : > { %1455 = vmatmul.msk.bf16.vlgmr.msra.gmra.mxu0 %vm450_vm1, %v440_v29  ;;  %1489 = vmatmul.msk.bf16.gmra.mxu3 %vm450_vm1, %v1896_v18  ;;  %v397_v41 = vrot.slane %v396_v31, 4  ;;  %v314_v42 = vor.u32 %v313_v32, %v310_v25  ;;  %v329_v43 = vrot.slane %v327_v33, 5  ;;  %v407_v47 = vshll.u32 %v1906_v34, 16  ;;  %v1953_v32 = vld [vmem:[%s1813_s15 + $0x3c] sm:$0xff] }
  0x26   : > { %v324_v45 = vor.u32 %v323_v38, %v319_v37  ;;  %v413_v48 = vshll.u32 %v1909_v35, 16  ;;  %v436_v50 = vunpack.c.l.b16 %v392_v36  ;;  %v417_v53 = vshrl.u32 %v1909_v35, 16  ;;  %v1529_v38 = vld [vmem:[%s2304_s1 + $0x10] sm:$0x3] }
  0x27   : > { %v402_v49 = vsel %vm1857_vm4, %v397_v41, %v401_v20  ;;  %v315_v51 = vrot.slane %v314_v42, 4  ;;  %1486 = vmatmul.msk.bf16.gmra.mxu1 %vm450_vm1, %v1902_v28  ;;  %v406_v57 = vrot.slane %v404_v46, 4  ;;  %v409_v58 = vrot.slane %v407_v47, 5  ;;  %v1945_v20 = vld [vmem:[%s1813_s15 + $0x20] sm:$0x1] }
  0x28   : > { %v437_v54 = vunpack.c.l.b16 %v402_v49  ;;  %v325_v55 = vrot.slane %v324_v45, 4  ;;  %v415_v61 = vrot.slane %v413_v48, 5  ;;  %v419_v63 = vrot.slane %v417_v53, 4  ;;  %v1540_v49 = vld [vmem:[%s2304_s1 + $0x10] sm:$0xc] }
  0x29   : > { %v320_v60 = vsel %vm1857_vm4, %v315_v51, %v319_v37  ;;  %v423_v4 = vshll.u32 %v1924_v52, 16  ;;  %v332_v5 = vshrl.u32 %v1928_v59, 16  ;;  %v335_v6 = vshll.u32 %v1928_v59, 16  ;;  %v1548_v51 = vld [vmem:[%s2304_s1 + $0x14] sm:$0x3] }
  0x2a   : > { %v330_v1 = vsel %vm1857_vm4, %v325_v55, %v329_v43  ;;  %v1937_v2 = vpack.c.b16 %v437_v54, %v436_v50  ;;  %v430_v8 = vunpack.c.l.b16 %v320_v60  ;;  %v410_v9 = vor.u32 %v409_v58, %v406_v57  ;;  %v1960_v43 = vld [vmem:[%s1813_s15 + $0x18] sm:$0xff]  ;;  %v1522_v50 = vld [vmem:[%s2304_s1 + $0xc] sm:$0x3] }
  0x2b   : > { %v341_v10 = vshll.u32 %v1933_v0, 16  ;;  %v345_v13 = vshrl.u32 %v1933_v0, 16  ;;  %v431_v17 = vunpack.c.l.b16 %v330_v1  ;;  %v420_v19 = vor.u32 %v419_v63, %v415_v61 }
  0x2c   : > { %v334_v21 = vrot.slane %v332_v5, 4  ;;  %v337_v24 = vrot.slane %v335_v6, 5  ;;  %v351_v29 = vshll.u32 %v1945_v20, 16  ;;  %v411_v33 = vrot.slane %v410_v9, 4 }
  0x2d   : > { %v343_v25 = vrot.slane %v341_v10, 5  ;;  %v347_v26 = vrot.slane %v345_v13, 4  ;;  %v1950_v31 = vpack.c.b16 %v431_v17, %v430_v8  ;;  %v421_v36 = vrot.slane %v420_v19, 4 }
  0x2e   : > { %v338_v27 = vor.u32 %v337_v24, %v334_v21  ;;  %v425_v37 = vrot.slane %v423_v4, 5  ;;  %v977_v42 = vsel %vm469_vm0, %v1529_v38, 0  ;;  %v353_v46 = vrot.slane %v351_v29, 5 }
  0x2f   : > { %v348_v41 = vor.u32 %v347_v26, %v343_v25  ;;  %986 = vmatpush.bf16.msra.mxu2 %v977_v42  ;;  %v416_v47 = vsel %vm1857_vm4, %v411_v33, %v415_v61  ;;  %v1059_v54 = vunpack.c.l.b16 %v1540_v49  ;;  %v913_v55 = vsel %vm469_vm0, %v1522_v50, 0 }
  0x30   : > { %v339_v45 = vrot.slane %v338_v27, 4  ;;  %v426_v48 = vsel %vm1857_vm4, %v421_v36, %v425_v37  ;;  %v1135_v57 = vsel %vm469_vm0, %v1548_v51, 0  ;;  %v623_v58 = vrot.slane %v1890_v11, 5  ;;  %922 = vmatpush.bf16.msrb.mxu1 %v913_v55 }
  0x31   : > { %v349_v53 = vrot.slane %v348_v41, 4  ;;  %1144 = vmatpush.bf16.msra.mxu0 %v1135_v57  ;;  %v620_v60 = vrot.slane %v1885_v7, 5  ;;  %v1060_v61 = vpack.c.b16 %v1059_v54, %v1059_v54  ;;  %v1492_v63 = vrot.slane %v1876_v62, 9 }
  0x32   : > { %v438_v1 = vunpack.c.l.b16 %v416_v47  ;;  %v439_v4 = vunpack.c.l.b16 %v426_v48  ;;  %v344_v6 = vsel %vm1857_vm4, %v339_v45, %v343_v25  ;;  %v613_v21 = vrot.slane %v1840_v23, 5 }
  0x33   : > { %1459 = vmatmul.msk.bf16.gmra.mxu2 %vm450_vm1, %v1937_v2  ;;  %v622_v5 = vrot.slane %v620_v60, 4  ;;  %v354_v11 = vsel %vm1857_vm4, %v349_v53, %v353_v46  ;;  %v1061_v8 = vrot.slane %v1060_v61, 2  ;;  %v621_v10 = vsel %vm1990_vm7, %v1492_v63, %v620_v60 }
  0x34   : > { %v1999_v13 = vpack.c.b16 %v439_v4, %v438_v1  ;;  %v432_v17 = vunpack.c.l.b16 %v344_v6  ;;  %v433_v19 = vunpack.c.l.b16 %v354_v11  ;;  %v656_v24 = vunpack.c.l.b16 %v621_v10  ;;  %v273_v10 = vld [vmem:[%s1813_s15 + $0x48] sm:$0xf] }
  0x35   : > { %1456 = vmatmul.msk.bf16.gmra.mxu0 %vm450_vm1, %v1950_v31  ;;  %1490 = vmatmul.msk.bf16.gmra.mxu3 %vm450_vm1, %v1953_v32  ;;  %v1066_v7 = vsel %vm469_vm0, %v1061_v8, 0  ;;  %v624_v62 = vsel %vm1990_vm7, %v622_v5, %v623_v58  ;;  %v616_v27 = vrot.slane %v1844_v30, 5  ;;  %v1491_v29 = vrot.slane %v1837_v22, 9 }
  0x36   : > { %1075 = vmatpush.bf16.msra.mxu3 %v1066_v7  ;;  %v657_v25 = vunpack.c.l.b16 %v624_v62  ;;  %v2004_v26 = vpack.c.b16 %v433_v19, %v432_v17  ;;  %v615_v33 = vrot.slane %v613_v21, 4  ;;  %v627_v23 = vrot.slane %v1933_v0, 5  ;;  %v275_v62 = vld [vmem:[%s1813_s15 + $0x50] sm:$0x1] }
  0x37   : > { %1487 = vmatmul.msk.bf16.gmra.mxu1 %vm450_vm1, %v1960_v43  ;;  %v614_v37 = vsel %vm1990_vm7, %v1491_v29, %v613_v21  ;;  %v1493_v22 = vrot.slane %v1928_v59, 9  ;;  %v630_v41 = vrot.slane %v1945_v20, 5  ;;  %v634_v59 = vrot.slane %v1824_v15, 5 }
  0x38   : > { %v667_v36 = vpack.c.b16 %v657_v25, %v656_v24  ;;  %v617_v38 = vsel %vm1990_vm7, %v615_v33, %v616_v27  ;;  %v629_v30 = vrot.slane %v627_v23, 4  ;;  %v654_v42 = vunpack.c.l.b16 %v614_v37 }
  0x39   : > { %v655_v45 = vunpack.c.l.b16 %v617_v38  ;;  %v1494_v20 = vrot.slane %v1821_v14, 9  ;;  %v636_v50 = vrot.slane %v634_v59, 4  ;;  %v637_v51 = vrot.slane %v1827_v16, 5 }
  0x3a   : > { %v631_v0 = vsel %vm1990_vm7, %v629_v30, %v630_v41  ;;  %v641_v14 = vrot.slane %v1862_v44, 5  ;;  %v1495_v15 = vrot.slane %v1853_v39, 9  ;;  %v644_v58 = vrot.slane %v1871_v56, 5 }
  0x3b   : > { %v666_v46 = vpack.c.b16 %v655_v45, %v654_v42  ;;  %v659_v48 = vunpack.c.l.b16 %v631_v0  ;;  %v635_v53 = vsel %vm1990_vm7, %v1494_v20, %v634_v59  ;;  %v638_v54 = vsel %vm1990_vm7, %v636_v50, %v637_v51  ;;  %v2093_v42 = vld [vmem:[%s1813_s15 + $0x48] sm:$0xff] }
  0x3c   : > { %v661_v55 = vunpack.c.l.b16 %v638_v54  ;;  %v643_v16 = vrot.slane %v641_v14, 4  ;;  %v642_v60 = vsel %vm1990_vm7, %v1495_v15, %v641_v14  ;;  %v648_v39 = vrot.slane %v1909_v35, 5 }
  0x3d   : > { %v662_v63 = vunpack.c.l.b16 %v642_v60  ;;  %v1496_v56 = vrot.slane %v1906_v34, 9  ;;  %v651_v5 = vrot.slane %v1924_v52, 5  ;;  %v274_v34 = vld [vmem:[%s1813_s15 + $0x4c] sm:$0xf]  ;;  %v1521_v17 = vrot.slane %v273_v10, 9 }
  0x3e   : > { %v645_v61 = vsel %vm1990_vm7, %v643_v16, %v644_v58  ;;  %v650_v4 = vrot.slane %v648_v39, 4  ;;  %v900_v52 = vrot.slane %v274_v34, 5  ;;  %v903_v21 = vrot.slane %v275_v62, 5 }
  0x3f   : > { %v663_v1 = vunpack.c.l.b16 %v645_v61  ;;  %v649_v6 = vsel %vm1990_vm7, %v1496_v56, %v648_v39  ;;  %v809_v24 = vshrl.u32 %v273_v10, 16  ;;  %v812_v25 = vshll.u32 %v273_v10, 16 }
  0x40   : > { %v652_v11 = vsel %vm1990_vm7, %v650_v4, %v651_v5  ;;  %v664_v8 = vunpack.c.l.b16 %v649_v6  ;;  %v902_v19 = vrot.slane %v900_v52, 4  ;;  %v818_v27 = vshll.u32 %v274_v34, 16 }
  0x41   : > { %v2058_v44 = vpack.c.b16 %v663_v1, %v662_v63  ;;  %v665_v7 = vunpack.c.l.b16 %v652_v11  ;;  %v822_v29 = vshrl.u32 %v274_v34, 16  ;;  %v901_v33 = vsel %vm1990_vm7, %v1521_v17, %v900_v52 }
  0x42   : > { %v814_v37 = vrot.slane %v812_v25, 5  ;;  %v820_v38 = vrot.slane %v818_v27, 5  ;;  %v906_v30 = vunpack.c.l.b16 %v901_v33  ;;  %v828_v0 = vshll.u32 %v275_v62, 16  ;;  %v1604_v27 = vld [vmem:[%s2306_s3 + $0x30] sm:$0xff]  ;;  %v2161_v33 = vld [vmem:[%s1813_s15 + $0x58] sm:$0xf] }
  0x43   : > { %1460 = vmatmul.msk.bf16.gmra.mxu2 %vm450_vm1, %v1999_v13  ;;  %v2075_v35 = vpack.c.b16 %v665_v7, %v664_v8 }
  0x44   : > { %v830_v59 = vrot.slane %v828_v0, 5 }
  0x45   : > { %1457 = vmatmul.msk.bf16.gmra.mxu0 %vm450_vm1, %v2004_v26  ;;  %1508 = vmatmul.msk.bf16.vlgmr.msrb.gmra.mxu3 %vm450_vm1, %v1902_v28  ;;  %v628_v28 = vsel %vm1990_vm7, %v1493_v22, %v627_v23  ;;  %v811_v23 = vrot.slane %v809_v24, 4  ;;  %v824_v22 = vrot.slane %v822_v29, 4  ;;  %v2158_v29 = vld [vmem:[%s1813_s15 + $0x54] sm:$0xf] }
  0x46   : > { %v658_v47 = vunpack.c.l.b16 %v628_v28 }
  0x47   : > { %1523 = vmatmul.msk.bf16.vlgmr.msrb.gmra.mxu1 %vm450_vm1, %v667_v36  ;;  %v815_v45 = vor.u32 %v814_v37, %v811_v23  ;;  %v825_v28 = vor.u32 %v824_v22, %v820_v38  ;;  %v1031_v37 = vshrl.u32 %v2158_v29, 16  ;;  %v1044_v22 = vshrl.u32 %v2161_v33, 16 }
  0x48   : > { %v2025_v49 = vpack.c.b16 %v659_v48, %v658_v47 }
  0x49   : > { %v816_v47 = vrot.slane %v815_v45, 4  ;;  %v826_v48 = vrot.slane %v825_v28, 4  ;;  %v1033_v28 = vrot.slane %v1031_v37, 4 }
  0x4b   : > { %v821_v50 = vsel %vm1857_vm4, %v816_v47, %v820_v38  ;;  %v831_v51 = vsel %vm1857_vm4, %v826_v48, %v830_v59  ;;  %v1040_v38 = vshll.u32 %v2161_v33, 16  ;;  %v1046_v48 = vrot.slane %v1044_v22, 4 }
  0x4c   : > { %v834_v54 = vunpack.c.l.b16 %v831_v51 }
  0x4d   : > { %v1042_v47 = vrot.slane %v1040_v38, 5 }
  0x53   : > { %1497 = vmatmul.msk.bf16.vlgmr.msrb.gmra.mxu2 %vm450_vm1, %v666_v46 }
  0x55   : > { %1515 = vmatmul.msk.bf16.vlgmr.msrb.gmra.mxu0 %vm450_vm1, %v1950_v31  ;;  %1509 = vmatmul.msk.bf16.gmra.mxu3 %vm450_vm1, %v1960_v43  ;;  %v660_v31 = vunpack.c.l.b16 %v635_v53  ;;  %v833_v53 = vunpack.c.l.b16 %v821_v50 }
  0x57   : > { %1524 = vmatmul.msk.bf16.gmra.mxu1 %vm450_vm1, %v2025_v49  ;;  %v2041_v57 = vpack.c.b16 %v661_v55, %v660_v31  ;;  %v2109_v55 = vpack.c.b16 %v834_v54, %v833_v53 }
  0x63   : > { %1498 = vmatmul.msk.bf16.gmra.mxu2 %vm450_vm1, %v667_v36  ;;  %v904_v36 = vsel %vm1990_vm7, %v902_v19, %v903_v21 }
  0x64   : > { %v907_v41 = vunpack.c.l.b16 %v904_v36 }
  0x65   : > { %1516 = vmatmul.msk.bf16.gmra.mxu0 %vm450_vm1, %v2004_v26  ;;  %1510 = vmatmul.msk.bf16.gmra.mxu3 %vm450_vm1, %v1817_v12 }
  0x66   : > { %v2095_v46 = vpack.c.b16 %v907_v41, %v906_v30 }
  0x67   : > { %1525 = vmatmul.msk.bf16.gmra.mxu1 %vm450_vm1, %v2041_v57 }
  0x73   : > { %1499 = vmatmul.msk.bf16.gmra.mxu2 %vm450_vm1, %v2025_v49 }
  0x75   : > { %1517 = vmatmul.msk.bf16.gmra.mxu0 %vm450_vm1, %v1878_v3  ;;  %1511 = vmatmul.msk.bf16.gmra.mxu3 %vm450_vm1, %v1896_v18 }
  0x77   : > { %1526 = vmatmul.msk.bf16.gmra.mxu1 %vm450_vm1, %v2058_v44 }
  0x83   : > { %1500 = vmatmul.msk.bf16.gmra.mxu2 %vm450_vm1, %v2041_v57 }
  0x85   : > { %1518 = vmatmul.msk.bf16.gmra.mxu0 %vm450_vm1, %v1937_v2  ;;  %1512 = vmatmul.msk.bf16.gmra.mxu3 %vm450_vm1, %v1953_v32 }
  0x87   : > { %1527 = vmatmul.msk.bf16.gmra.mxu1 %vm450_vm1, %v2075_v35 }
  0x93   : > { %1501 = vmatmul.msk.bf16.gmra.mxu2 %vm450_vm1, %v2058_v44 }
  0x95   : > { %1519 = vmatmul.msk.bf16.gmra.mxu0 %vm450_vm1, %v1999_v13  ;;  %1513 = vmatmul.msk.bf16.gmra.mxu3 %vm450_vm1, %v2093_v42 }
  0x97   : > { %1528 = vmatmul.msk.bf16.gmra.mxu1 %vm450_vm1, %v2095_v46 }
  0x98   : > { %v587_v20 = vpop.f32.mrf.mxu3 }
  0xa0   : > { %v589_v31 = vpop.f32.mrf.mxu3 }
  0xa2   : > { %v482_v14 = vpop.f32.mrf.mxu0 }
  0xa3   : > { %1502 = vmatmul.msk.bf16.gmra.mxu2 %vm450_vm1, %v2075_v35 }
  0xa5   : > { %1520 = vmatmul.msk.bf16.gmra.mxu0 %vm450_vm1, %v2109_v55  ;;  %1541 = vmatmul.msk.bf16.vlgmr.msra.gmra.mxu3 %vm450_vm1, %v2004_v26 }
  0xa6   : > { %v497_v15 = vpop.f32.mrf.mxu2 }
  0xa7   : > { %v2113_v16 = vadd.f32 %v587_v20, %v497_v15  ;;  %v278_v20 = vld [vmem:[%s1813_s15 + $0x5c] sm:$0x1]  ;;  %v1603_v15 = vld [vmem:[%s2306_s3 + $0x28] sm:$0xff] }
  0xa8   : > { %v592_v58 = vpop.f32.mrf.mxu3  ;;  %v1125_v37 = vrot.slane %v278_v20, 5 }
  0xaa   : > { %v484_v60 = vpop.f32.mrf.mxu0 }
  0xae   : > { %v499_v61 = vpop.f32.mrf.mxu2 }
  0xaf   : > { %v2117_v63 = vadd.f32 %v589_v31, %v499_v61  ;;  %v1047_v31 = vor.u32 %v1046_v48, %v1042_v47 }
  0xb0   : > { %v594_v1 = vpop.f32.mrf.mxu3 }
  0xb2   : > { %v487_v39 = vpop.f32.mrf.mxu0 }
  0xb3   : > { %1534 = vmatmul.msk.bf16.vlgmr.msra.gmra.mxu2 %vm450_vm1, %v1960_v43 }
  0xb5   : > { %1549 = vmatmul.msk.bf16.vlgmr.msra.gmra.mxu0 %vm450_vm1, %v2025_v49  ;;  %1542 = vmatmul.msk.bf16.gmra.mxu3 %vm450_vm1, %v1878_v3  ;;  %v572_v3 = vpop.f32.mrf.mxu1 }
  0xb6   : > { %v502_v56 = vpop.f32.mrf.mxu2  ;;  %v573_v19 = vadd.f32 %v572_v3, %v482_v14  ;;  %v1050_v14 = vshll.u32 %v278_v20, 16 }
  0xb7   : > { %v2123_v4 = vadd.f32 %v592_v58, %v502_v56  ;;  %v1048_v56 = vrot.slane %v1047_v31, 4 }
  0xb8   : > { %v597_v26 = vpop.f32.mrf.mxu3 }
  0xba   : > { %v2127_v5 = vpop.f32.mrf.mxu0 }
  0xbe   : > { %v504_v6 = vpop.f32.mrf.mxu2 }
  0xbf   : > { %v2129_v11 = vadd.f32 %v594_v1, %v504_v6 }
  0xc0   : > { %v599_v8 = vpop.f32.mrf.mxu3 }
  0xc2   : > { %v2133_v43 = vpop.f32.mrf.mxu0 }
  0xc3   : > { %1535 = vmatmul.msk.bf16.gmra.mxu2 %vm450_vm1, %v1817_v12  ;;  %v1605_v12 = vld [vmem:[%s2306_s3 + $0x38] sm:$0xff] }
  0xc4   : > { %1290 = vmatpush.bf16.msra.mxu1 %v1605_v12 }
  0xc5   : > { %1550 = vmatmul.msk.bf16.gmra.mxu0 %vm450_vm1, %v2041_v57  ;;  %1543 = vmatmul.msk.bf16.gmra.mxu3 %vm450_vm1, %v1937_v2  ;;  %v574_v57 = vpop.f32.mrf.mxu1 }
  0xc6   : > { %v507_v7 = vpop.f32.mrf.mxu2  ;;  %v575_v30 = vadd.f32 %v574_v57, %v484_v60 }
  0xc7   : > { %v2137_v49 = vadd.f32 %v597_v26, %v507_v7  ;;  %v1052_v26 = vrot.slane %v1050_v14, 5  ;;  %v1600_v14 = vld [vmem:[%s2306_s3 + $0x10] sm:$0xff] }
  0xc8   : > { %v766_v34 = vpop.f32.mrf.mxu3  ;;  %1291 = vmatpush.bf16.msra.mxu1 %v1604_v27 }
  0xca   : > { %v2141_v52 = vpop.f32.mrf.mxu0 }
  0xcc   : > { %1292 = vmatpush.bf16.msra.mxu1 %v1603_v15 }
  0xcd   : > { %v577_v23 = vpop.f32.mrf.mxu1 }
  0xce   : > { %v509_v10 = vpop.f32.mrf.mxu2  ;;  %v578_v58 = vadd.f32 %v577_v23, %v487_v39 }
  0xcf   : > { %v2146_v62 = vadd.f32 %v599_v8, %v509_v10 }
  0xd0   : > { %v768_v17 = vpop.f32.mrf.mxu3 }
  0xd2   : > { %v855_v2 = vpop.f32.mrf.mxu0 }
  0xd3   : > { %1536 = vmatmul.msk.bf16.gmra.mxu2 %vm450_vm1, %v1896_v18 }
  0xd5   : > { %1551 = vmatmul.msk.bf16.gmra.mxu0 %vm450_vm1, %v2058_v44  ;;  %1544 = vmatmul.msk.bf16.gmra.mxu3 %vm450_vm1, %v1999_v13  ;;  %v1034_v13 = vshll.u32 %v2158_v29, 16  ;;  %v579_v60 = vpop.f32.mrf.mxu1 }
  0xd6   : > { %v702_v21 = vpop.f32.mrf.mxu2 }
  0xd7   : > { %v732_v24 = vadd.f32 %v702_v21, %v573_v19  ;;  %v1036_v0 = vrot.slane %v1034_v13, 5  ;;  %v1602_v19 = vld [vmem:[%s2306_s3 + $0x20] sm:$0xff] }
  0xd8   : > { %v771_v18 = vpop.f32.mrf.mxu3  ;;  %1293 = vmatpush.bf16.msra.mxu1 %v1602_v19 }
  0xd9   : > { %v796_v25 = vadd.f32 %v766_v34, %v732_v24  ;;  %v1037_v54 = vor.u32 %v1036_v0, %v1033_v28  ;;  %v1053_v34 = vsel %vm1857_vm4, %v1048_v56, %v1052_v26  ;;  %v1597_v0 = vld [vmem:[%s1813_s15 + $0x54] sm:$0xff] }
  0xda   : > { %v857_v44 = vpop.f32.mrf.mxu0 }
  0xdb   : > { %v2163_v36 = vadd.f32 %v855_v2, %v796_v25 }
  0xde   : > { %v704_v41 = vpop.f32.mrf.mxu2 }
  0xdf   : > { %v733_v45 = vadd.f32 %v704_v41, %v575_v30  ;;  %v1601_v41 = vld [vmem:[%s2306_s3 + $0x18] sm:$0xff] }
  0xe0   : > { %v773_v50 = vpop.f32.mrf.mxu3  ;;  %1294 = vmatpush.bf16.msra.mxu1 %v1601_v41 }
  0xe1   : > { %v797_v59 = vadd.f32 %v768_v17, %v733_v45  ;;  %v582_v17 = vpop.f32.mrf.mxu1 }
  0xe2   : > { %v860_v53 = vpop.f32.mrf.mxu0  ;;  %v583_v27 = vadd.f32 %v582_v17, %v2133_v43 }
  0xe3   : > { %1537 = vmatmul.msk.bf16.gmra.mxu2 %vm450_vm1, %v1953_v32  ;;  %v2172_v51 = vadd.f32 %v857_v44, %v797_v59  ;;  %v1038_v32 = vrot.slane %v1037_v54, 4  ;;  %v1547_v44 = vrot.slane %v2158_v29, 9 }
  0xe4   : > { %1295 = vmatpush.bf16.msra.mxu1 %v1600_v14 }
  0xe5   : > { %1552 = vmatmul.msk.bf16.gmra.mxu0 %vm450_vm1, %v2075_v35  ;;  %1545 = vmatmul.msk.bf16.gmra.mxu3 %vm450_vm1, %v2109_v55  ;;  %v1043_v39 = vsel %vm1857_vm4, %v1038_v32, %v1042_v47  ;;  %v580_v35 = vadd.f32 %v579_v60, %v2127_v5  ;;  %v1056_v55 = vunpack.c.l.b16 %v1053_v34  ;;  %v1122_v5 = vrot.slane %v2161_v33, 5 }
  0xe6   : > { %v707_v61 = vpop.f32.mrf.mxu2  ;;  %v1055_v57 = vunpack.c.l.b16 %v1043_v39 }
  0xe7   : > { %v734_v1 = vadd.f32 %v707_v61, %v578_v58  ;;  %v1123_v43 = vsel %vm1990_vm7, %v1547_v44, %v1122_v5 }
  0xe8   : > { %v776_v8 = vpop.f32.mrf.mxu3  ;;  %v1057_v40 = vpack.c.b16 %v1056_v55, %v1055_v57  ;;  %v1128_v47 = vunpack.c.l.b16 %v1123_v43 }
  0xe9   : > { %v798_v6 = vadd.f32 %v771_v18, %v734_v1  ;;  %v584_v38 = vpop.f32.mrf.mxu1 }
  0xea   : > { %v862_v3 = vpop.f32.mrf.mxu0  ;;  %v585_v29 = vadd.f32 %v584_v38, %v2141_v52 }
  0xeb   : > { %v2181_v7 = vadd.f32 %v860_v53, %v798_v6 }
  0xee   : > { %v709_v12 = vpop.f32.mrf.mxu2 }
  0xef   : > { %v735_v10 = vadd.f32 %v709_v12, %v580_v35 }
  0xf0   : > { %v778_v21 = vpop.f32.mrf.mxu3 }
  0xf1   : > { %v799_v2 = vadd.f32 %v773_v50, %v735_v10  ;;  %v924_v12 = vpop.f32.mrf.mxu1 }
  0xf2   : > { %v865_v25 = vpop.f32.mrf.mxu0 }
  0xf3   : > { %1538 = vmatmul.msk.bf16.gmra.mxu2 %vm450_vm1, %v2093_v42  ;;  %v2193_v24 = vadd.f32 %v862_v3, %v799_v2  ;;  %v1124_v42 = vrot.slane %v1122_v5, 4 }
  0xf5   : > { %1553 = vmatmul.msk.bf16.gmra.mxu0 %vm450_vm1, %v2095_v46  ;;  %1546 = vmatmul.msk.bf16.gmra.mxu3 %vm450_vm1, %v1057_v40  ;;  %v1126_v46 = vsel %vm1990_vm7, %v1124_v42, %v1125_v37 }
  0xf6   : > { %v712_v18 = vpop.f32.mrf.mxu2  ;;  %v1129_v48 = vunpack.c.l.b16 %v1126_v46 }
  0xf7   : > { %v736_v23 = vadd.f32 %v712_v18, %v583_v27 }
  0xf8   : > { %v781_v22 = vpop.f32.mrf.mxu3  ;;  %v1130_v9 = vpack.c.b16 %v1129_v48, %v1128_v47 }
  0xf9   : > { %v800_v13 = vadd.f32 %v776_v8, %v736_v23 }
  0xfa   : > { %v867_v33 = vpop.f32.mrf.mxu0 }
  0xfb   : > { %v2201_v30 = vadd.f32 %v865_v25, %v800_v13 }
  0xfe   : > { %v714_v45 = vpop.f32.mrf.mxu2 }
  0xff   : > { %v737_v28 = vadd.f32 %v714_v45, %v585_v29 }
 0x100   : > { %v783_v20 = vpop.f32.mrf.mxu3 }
 0x101   : > { %v801_v59 = vadd.f32 %v778_v21, %v737_v28  ;;  %v926_v21 = vpop.f32.mrf.mxu1 }
 0x102   : > { %v870_v53 = vpop.f32.mrf.mxu0  ;;  %v955_v28 = vadd.f32 %v926_v21, %v2172_v51 }
 0x103   : > { %1539 = vmatmul.msk.bf16.gmra.mxu2 %vm450_vm1, %v1597_v0  ;;  %v2213_v50 = vadd.f32 %v867_v33, %v801_v59 }
 0x105   : > { %1554 = vmatmul.msk.bf16.gmra.mxu0 %vm450_vm1, %v1130_v9 }
 0x106   : > { %v717_v54 = vpop.f32.mrf.mxu2 }
 0x107   : > { %v738_v31 = vadd.f32 %v717_v54, %v2113_v16  ;;  %v1599_v16 = vld [vmem:[%s2306_s3 + $0x8] sm:$0xff] }
 0x108   : > { %v786_v15 = vpop.f32.mrf.mxu3  ;;  %1296 = vmatpush.bf16.msra.mxu1 %v1599_v16 }
 0x109   : > { %v802_v52 = vadd.f32 %v781_v22, %v738_v31  ;;  %v929_v42 = vpop.f32.mrf.mxu1 }
 0x10a   : > { %v872_v60 = vpop.f32.mrf.mxu0  ;;  %v956_v31 = vadd.f32 %v929_v42, %v2181_v7 }
 0x10b   : > { %v2220_v58 = vadd.f32 %v870_v53, %v802_v52 }
 0x10e   : > { %v719_v61 = vpop.f32.mrf.mxu2 }
 0x10f   : > { %v739_v1 = vadd.f32 %v719_v61, %v2117_v63 }
 0x110   : > { %v788_v56 = vpop.f32.mrf.mxu3 }
 0x111   : > { %v803_v32 = vadd.f32 %v783_v20, %v739_v1  ;;  %v931_v46 = vpop.f32.mrf.mxu1 }
 0x112   : > { %v875_v6 = vpop.f32.mrf.mxu0 }
 0x113   : > { %v2223_v26 = vadd.f32 %v872_v60, %v803_v32 }
 0x116   : > { %v722_v8 = vpop.f32.mrf.mxu2 }
 0x117   : > { %v740_v3 = vadd.f32 %v722_v8, %v2123_v4  ;;  %v1598_v4 = vld [vmem:[%s2306_s3] sm:$0xff] }
 0x118   : > { %v791_v34 = vpop.f32.mrf.mxu3  ;;  %1297 = vmatpush.bf16.msra.mxu1 %v1598_v4 }
 0x119   : > { %v804_v39 = vadd.f32 %v786_v15, %v740_v3  ;;  %v934_v53 = vpop.f32.mrf.mxu1 }
 0x11a   : > { %v877_v10 = vpop.f32.mrf.mxu0 }
 0x11b   : > { %v2229_v35 = vadd.f32 %v875_v6, %v804_v39  ;;  %v957_v6 = vadd.f32 %v931_v46, %v2193_v24 }
 0x11e   : > { %v724_v63 = vpop.f32.mrf.mxu2 }
 0x11f   : > { %v741_v57 = vadd.f32 %v724_v63, %v2129_v11 }
 0x120   : > { %v793_v17 = vpop.f32.mrf.mxu3 }
 0x121   : > { %v805_v55 = vadd.f32 %v788_v56, %v741_v57  ;;  %v936_v16 = vpop.f32.mrf.mxu1  ;;  %v958_v57 = vadd.f32 %v934_v53, %v2201_v30 }
 0x122   : > { %v880_v19 = vpop.f32.mrf.mxu0 }
 0x123   : > { %v2232_v2 = vadd.f32 %v877_v10, %v805_v55 }
 0x126   : > { %v727_v40 = vpop.f32.mrf.mxu2 }
 0x127   : > { %v742_v25 = vadd.f32 %v727_v40, %v2137_v49  ;;  %v954_v49 = vadd.f32 %v924_v12, %v2163_v36 }
 0x128   : > { %v1077_v27 = vpop.f32.mrf.mxu3 }
 0x129   : > { %v806_v5 = vadd.f32 %v791_v34, %v742_v25  ;;  %v939_v25 = vpop.f32.mrf.mxu1 }
 0x12a   : > { %v882_v23 = vpop.f32.mrf.mxu0 }
 0x12b   : > { %v2238_v18 = vadd.f32 %v880_v19, %v806_v5 }
 0x12e   : > { %v729_v11 = vpop.f32.mrf.mxu2 }
 0x12f   : > { %v743_v44 = vadd.f32 %v729_v11, %v2146_v62  ;;  %v2248_v62 = vld [vmem:[%s2305_s2] ss:$0 sm:$0xff] }
 0x130   : > { %v1079_v13 = vpop.f32.mrf.mxu3 }
 0x131   : > { %v807_v37 = vadd.f32 %v793_v17, %v743_v44 }
 0x132   : > { %v1146_v22 = vpop.f32.mrf.mxu0 }
 0x133   : > { %v2241_v38 = vadd.f32 %v882_v23, %v807_v37 }
 0x136   : > { %v988_v33 = vpop.f32.mrf.mxu2 }
 0x137   : > { %v1018_v43 = vadd.f32 %v988_v33, %v954_v49  ;;  %v960_v33 = vadd.f32 %v939_v25, %v2220_v58 }
 0x138   : > { %v1082_v41 = vpop.f32.mrf.mxu3 }
 0x139   : > { %v1107_v29 = vadd.f32 %v1077_v27, %v1018_v43  ;;  %v959_v27 = vadd.f32 %v936_v16, %v2213_v50 }
 0x13a   : > { %v1148_v45 = vpop.f32.mrf.mxu0 }
 0x13b   : > { %v1176_v47 = vadd.f32 %v1146_v22, %v1107_v29 }
 0x13d   : > { %v1192_v36 = vadd.f32 %v2248_v62, %v1176_v47 }
 0x13e   : > { %v990_v0 = vpop.f32.mrf.mxu2 }
 0x13f   : > { %v1019_v48 = vadd.f32 %v990_v0, %v955_v28  ;;  %v1204_v14 = vmax.f32 %v1192_v36, 0.0 }
 0x140   : > { %v1084_v20 = vpop.f32.mrf.mxu3 }
 0x141   : > { %v1108_v59 = vadd.f32 %v1079_v13, %v1019_v48  ;;  %v941_v13 = vpop.f32.mrf.mxu1 }
 0x142   : > { %v1151_v54 = vpop.f32.mrf.mxu0 }
 0x143   : > { %v1177_v9 = vadd.f32 %v1148_v45, %v1108_v59  ;;  %v961_v59 = vadd.f32 %v941_v13, %v2223_v26 }
 0x145   : > { %v1193_v52 = vadd.f32 %v2248_v62, %v1177_v9 }
 0x146   : > { %v993_v51 = vpop.f32.mrf.mxu2 }
 0x147   : > { %v1205_v15 = vmax.f32 %v1193_v52, 0.0  ;;  %v1020_v60 = vadd.f32 %v993_v51, %v956_v31 }
 0x148   : > { %v1087_v1 = vpop.f32.mrf.mxu3 }
 0x149   : > { %v1216_v61 = vpack.c.bf16 %v1205_v15, %v1204_v14  ;;  %v1109_v32 = vadd.f32 %v1082_v41, %v1020_v60  ;;  %v944_v47 = vpop.f32.mrf.mxu1 }
 0x14a   : > { %v1153_v56 = vpop.f32.mrf.mxu0  ;;  %v962_v51 = vadd.f32 %v944_v47, %v2229_v35 }
 0x14b   : > { %1298 = vmatmul.bf16.vlgmr.msra.gmra.mxu1 %v1216_v61  ;;  %v1178_v3 = vadd.f32 %v1151_v54, %v1109_v32 }
 0x14d   : > { %v1194_v7 = vadd.f32 %v2248_v62, %v1178_v3 }
 0x14e   : > { %v995_v8 = vpop.f32.mrf.mxu2 }
 0x14f   : > { %v1021_v39 = vadd.f32 %v995_v8, %v957_v6  ;;  %v1206_v21 = vmax.f32 %v1194_v7, 0.0 }
 0x150   : > { %v1089_v63 = vpop.f32.mrf.mxu3 }
 0x151   : > { %v1110_v34 = vadd.f32 %v1084_v20, %v1021_v39  ;;  %v946_v15 = vpop.f32.mrf.mxu1 }
 0x152   : > { %v1156_v10 = vpop.f32.mrf.mxu0  ;;  %v963_v16 = vadd.f32 %v946_v15, %v2232_v2 }
 0x153   : > { %v1179_v12 = vadd.f32 %v1153_v56, %v1110_v34 }
 0x155   : > { %v1195_v55 = vadd.f32 %v2248_v62, %v1179_v12 }
 0x156   : > { %v998_v17 = vpop.f32.mrf.mxu2 }
 0x157   : > { %v1022_v19 = vadd.f32 %v998_v17, %v958_v57  ;;  %v1207_v40 = vmax.f32 %v1195_v55, 0.0 }
 0x158   : > { %v1092_v11 = vpop.f32.mrf.mxu3 }
 0x159   : > { %v1217_v24 = vpack.c.bf16 %v1207_v40, %v1206_v21  ;;  %v1111_v4 = vadd.f32 %v1087_v1, %v1022_v19  ;;  %v949_v12 = vpop.f32.mrf.mxu1 }
 0x15a   : > { %v1158_v5 = vpop.f32.mrf.mxu0 }
 0x15b   : > { %1303 = vmatmul.bf16.gmra.mxu1 %v1217_v24  ;;  %v1180_v44 = vadd.f32 %v1156_v10, %v1111_v4 }
 0x15d   : > { %v1196_v22 = vadd.f32 %v2248_v62, %v1180_v44 }
 0x15e   : > { %v1000_v23 = vpop.f32.mrf.mxu2 }
 0x15f   : > { %v1023_v42 = vadd.f32 %v1000_v23, %v959_v27  ;;  %v1208_v29 = vmax.f32 %v1196_v22, 0.0 }
 0x160   : > { %v1094_v28 = vpop.f32.mrf.mxu3 }
 0x161   : > { %v1112_v37 = vadd.f32 %v1089_v63, %v1023_v42  ;;  %v964_v63 = vadd.f32 %v949_v12, %v2238_v18  ;;  %v951_v24 = vpop.f32.mrf.mxu1 }
 0x162   : > { %v1161_v49 = vpop.f32.mrf.mxu0 }
 0x163   : > { %v1181_v30 = vadd.f32 %v1158_v5, %v1112_v37  ;;  %v965_v5 = vadd.f32 %v951_v24, %v2241_v38 }
 0x165   : > { %v1197_v43 = vadd.f32 %v2248_v62, %v1181_v30 }
 0x166   : > { %v1003_v46 = vpop.f32.mrf.mxu2 }
 0x167   : > { %v1024_v41 = vadd.f32 %v1003_v46, %v960_v33  ;;  %v1209_v45 = vmax.f32 %v1197_v43, 0.0  ;;  %v1686_v43 = vld [vmem:[%s2307_s4] ss:$0 sm:$0xff] }
 0x168   : > { %v1097_v54 = vpop.f32.mrf.mxu3 }
 0x169   : > { %v1218_v50 = vpack.c.bf16 %v1209_v45, %v1208_v29  ;;  %v1113_v0 = vadd.f32 %v1092_v11, %v1024_v41 }
 0x16a   : > { %v1163_v48 = vpop.f32.mrf.mxu0 }
 0x16b   : > { %1308 = vmatmul.bf16.gmra.mxu1 %v1218_v50  ;;  %v1182_v36 = vadd.f32 %v1161_v49, %v1113_v0 }
 0x16d   : > { %v1198_v31 = vadd.f32 %v2248_v62, %v1182_v36 }
 0x16e   : > { %v1005_v20 = vpop.f32.mrf.mxu2 }
 0x16f   : > { %v1025_v9 = vadd.f32 %v1005_v20, %v961_v59  ;;  %v1210_v1 = vmax.f32 %v1198_v31, 0.0 }
 0x170   : > { %v1099_v6 = vpop.f32.mrf.mxu3 }
 0x171   : > { %v1114_v53 = vadd.f32 %v1094_v28, %v1025_v9 }
 0x172   : > { %v1166_v52 = vpop.f32.mrf.mxu0 }
 0x173   : > { %v1183_v58 = vadd.f32 %v1163_v48, %v1114_v53 }
 0x175   : > { %v1199_v14 = vadd.f32 %v2248_v62, %v1183_v58 }
 0x176   : > { %v1008_v60 = vpop.f32.mrf.mxu2 }
 0x177   : > { %v1026_v61 = vadd.f32 %v1008_v60, %v962_v51  ;;  %v1211_v32 = vmax.f32 %v1199_v14, 0.0 }
 0x178   : > { %v1102_v55 = vpop.f32.mrf.mxu3 }
 0x179   : > { %v1219_v56 = vpack.c.bf16 %v1211_v32, %v1210_v1  ;;  %v1115_v26 = vadd.f32 %v1097_v54, %v1026_v61 }
 0x17a   : > { %v1168_v8 = vpop.f32.mrf.mxu0 }
 0x17b   : > { %1313 = vmatmul.bf16.gmra.mxu1 %v1219_v56  ;;  %v1184_v39 = vadd.f32 %v1166_v52, %v1115_v26 }
 0x17d   : > { %v1200_v10 = vadd.f32 %v2248_v62, %v1184_v39 }
 0x17e   : > { %v1010_v3 = vpop.f32.mrf.mxu2 }
 0x17f   : > { %v1027_v34 = vadd.f32 %v1010_v3, %v963_v16  ;;  %v1212_v21 = vmax.f32 %v1200_v10, 0.0 }
 0x180   : > { %v1104_v18 = vpop.f32.mrf.mxu3 }
 0x181   : > { %v1116_v7 = vadd.f32 %v1099_v6, %v1027_v34 }
 0x182   : > { %v1171_v25 = vpop.f32.mrf.mxu0 }
 0x183   : > { %v1185_v35 = vadd.f32 %v1168_v8, %v1116_v7 }
 0x185   : > { %v1201_v57 = vadd.f32 %v2248_v62, %v1185_v35 }
 0x186   : > { %v1013_v17 = vpop.f32.mrf.mxu2 }
 0x187   : > { %v1028_v19 = vadd.f32 %v1013_v17, %v964_v63  ;;  %v1213_v40 = vmax.f32 %v1201_v57, 0.0 }
 0x189   : > { %v1220_v2 = vpack.c.bf16 %v1213_v40, %v1212_v21  ;;  %v1117_v4 = vadd.f32 %v1102_v55, %v1028_v19 }
 0x18a   : > { %v1173_v42 = vpop.f32.mrf.mxu0 }
 0x18b   : > { %1318 = vmatmul.bf16.gmra.mxu1 %v1220_v2  ;;  %v1186_v23 = vadd.f32 %v1171_v25, %v1117_v4 }
 0x18d   : > { %v1202_v13 = vadd.f32 %v2248_v62, %v1186_v23 }
 0x18e   : > { %v1015_v27 = vpop.f32.mrf.mxu2 }
 0x18f   : > { %v1029_v11 = vadd.f32 %v1015_v27, %v965_v5  ;;  %v1214_v22 = vmax.f32 %v1202_v13, 0.0 }
 0x191   : > { %v1118_v44 = vadd.f32 %v1104_v18, %v1029_v11 }
 0x193   : > { %v1187_v37 = vadd.f32 %v1173_v42, %v1118_v44 }
 0x195   : > { %v1203_v30 = vadd.f32 %v2248_v62, %v1187_v37 }
 0x197   : > { %v1215_v49 = vmax.f32 %v1203_v30, 0.0 }
 0x199   : > { %v1221_v33 = vpack.c.bf16 %v1215_v49, %v1214_v22 }
 0x19b   : > { %1323 = vmatmul.bf16.gmra.mxu1 %v1221_v33 }
 0x1c8   : > { %v1299_v38 = vpop.f32.mrf.mxu1 }
 0x1c9   : > { %v1300_v41 = vadd.f32 %v1686_v43, %v1299_v38 }
 0x1d0   : > { %v1301_v46 = vpop.f32.mrf.mxu1 }
 0x1d1   : > { %v1302_v29 = vadd.f32 %v1686_v43, %v1301_v46 }
 0x1d3   : > { %v1609_v62 = vpack.c.bf16 %v1302_v29, %v1300_v41 }
 0x1d5   : > { %1610 = vst [vmem:[%s2280_s16] sm:$0xff] %v1609_v62  }
 0x1d8   : > { %v1304_v45 = vpop.f32.mrf.mxu1 }
 0x1d9   : > { %v1305_v50 = vadd.f32 %v1686_v43, %v1304_v45 }
 0x1e0   : > { %v1306_v28 = vpop.f32.mrf.mxu1 }
 0x1e1   : > { %v1307_v0 = vadd.f32 %v1686_v43, %v1306_v28 }
 0x1e3   : > { %v1614_v47 = vpack.c.bf16 %v1307_v0, %v1305_v50 }
 0x1e5   : > { %1636 = vst [vmem:[%s2280_s16 + $0x8] sm:$0xff] %v1614_v47  }
 0x1e8   : > { %v1309_v48 = vpop.f32.mrf.mxu1 }
 0x1e9   : > { %v1310_v20 = vadd.f32 %v1686_v43, %v1309_v48 }
 0x1f0   : > { %v1311_v59 = vpop.f32.mrf.mxu1 }
 0x1f1   : > { %v1312_v36 = vadd.f32 %v1686_v43, %v1311_v59 }
 0x1f3   : > { %v1619_v9 = vpack.c.bf16 %v1312_v36, %v1310_v20 }
 0x1f5   : > { %1637 = vst [vmem:[%s2280_s16 + $0x10] sm:$0xff] %v1619_v9  }
 0x1f8   : > { %v1314_v53 = vpop.f32.mrf.mxu1 }
 0x1f9   : > { %v1315_v58 = vadd.f32 %v1686_v43, %v1314_v53 }
 0x200   : > { %v1316_v54 = vpop.f32.mrf.mxu1 }
 0x201   : > { %v1317_v31 = vadd.f32 %v1686_v43, %v1316_v54 }
 0x203   : > { %v1624_v52 = vpack.c.bf16 %v1317_v31, %v1315_v58 }
 0x205   : > { %1638 = vst [vmem:[%s2280_s16 + $0x18] sm:$0xff] %v1624_v52  }
 0x208   : > { %v1319_v51 = vpop.f32.mrf.mxu1 }
 0x209   : > { %v1320_v15 = vadd.f32 %v1686_v43, %v1319_v51 }
 0x210   : > { %v1321_v14 = vpop.f32.mrf.mxu1 }
 0x211   : > { %v1322_v60 = vadd.f32 %v1686_v43, %v1321_v14 }
 0x213   : > { %v1629_v61 = vpack.c.bf16 %v1322_v60, %v1320_v15 }
 0x215   : > { %1639 = vst [vmem:[%s2280_s16 + $0x20] sm:$0xff] %v1629_v61  }
 0x218   : > { %v1324_v1 = vpop.f32.mrf.mxu1 }
 0x219   : > { %v1325_v56 = vadd.f32 %v1686_v43, %v1324_v1 }
 0x220   : > { %v1326_v32 = vpop.f32.mrf.mxu1 }
 0x221   : > { %v1327_v26 = vadd.f32 %v1686_v43, %v1326_v32 }
 0x223   : > { %v1634_v6 = vpack.c.bf16 %v1327_v26, %v1325_v56 }
 0x225   : > { %1640 = vst [vmem:[%s2280_s16 + $0x28] sm:$0xff] %v1634_v6  }
 0x226 PF: > { %s15_s22 = sadd.s32 1, %s1725_s22   ;;  %s2313_s18 = smov %s1717_s20 }
 0x227   : > { %p12_p7 = scmp.ge.s32.totalorder %s15_s22, 8   ;;  %s2314_s19 = smov %s1721_s21 }
 0x228   : > { %s2315_s20 = smov %s2318_s23  ;;  %s2316_s21 = smov %s2322_s24 }
 0x229   :  { %14 = sbr.rel (!%p12_p7) target bundleno = 3 (0x3), region = 73 }

</bundles_post_ra>
